<compile_context>
chip_gen: v7x
topology: tpu7x:2x2x1
jax: 0.10.0
libtpu: 0.0.40
codegen_flags: <defaults>
</compile_context>

<pallas_src>
import jax
import jax.numpy as jnp
from jax.experimental import pallas as pl
from jax.experimental.pallas import tpu as pltpu

C_OUT = 20  # both conv layers have 20 output channels (fixed by the module)


# ----------------------------------------------------------------------------- kernel

def _fused_kernel(xp_ref, w1p_ref, s1p_ref, w2p_ref, s2_ref, wfc_ref, bfc_ref, o_ref):
    """Fused conv_ch_comb -> conv_tp_half -> Flatten/Linear (BN folded, eval-mode dropout)."""
    # conv_ch_comb on paired (even|odd) timesteps: block-diag (2E, 2C) matmul, BN folded.
    h1 = jnp.einsum('tbe,ef->tbf', xp_ref[...], w1p_ref[...],
                    preferred_element_type=jnp.float32)
    h1 = jnp.maximum(h1 + s1p_ref[...], 0.0)                       # (Th, TB, 2C)

    # conv_tp_half: (1,2) stride-(1,2) conv == single (2C, C) matmul over [even|odd] channels.
    h2 = jnp.einsum('tbf,fc->tbc', h1, w2p_ref[...],
                    preferred_element_type=jnp.float32)
    h2 = jnp.maximum(h2 + s2_ref[...], 0.0)                        # (Th, TB, C)
    # TODO(synk): nn.Dropout is identity in eval mode; training-mode masking not implemented.

    # fc with torch's channel-major Flatten folded into wfc_r[t, c, s]:
    # batched-over-t matmul then reduce over t (leading, untiled dim).
    part = jnp.einsum('tbc,tcs->tbs', h2, wfc_ref[...],
                      preferred_element_type=jnp.float32)          # (Th, TB, S)
    o_ref[...] = (jnp.sum(part, axis=0) + bfc_ref[...]).astype(o_ref.dtype)


# ----------------------------------------------------------------------------- wrapper

def _pick_block_b(B):
    if B <= 128:
        return B
    for cand in (128, 64, 32, 16, 8):
        if B % cand == 0:
            return cand
    return B


def classification_net_forward(x, kparams):
    """x: (B, T, E) channels-last.  kparams: output of prepare_params()."""
    B, T, E = x.shape
    assert T % 2 == 0, "timepoint_num must be even (stride-2 conv drops nothing)"
    Th = T // 2
    C = C_OUT
    S = kparams['bfc'].shape[-1]

    # Free contiguous reshape + cheap leading-dim transpose: (B,T,E) -> (Th, B, 2E).
    # Lane axis packs [even-timestep electrodes | odd-timestep electrodes].
    xp = jnp.transpose(x.reshape(B, Th, 2 * E), (1, 0, 2))

    block_b = _pick_block_b(B)
    grid = (B // block_b,)

    in_specs = [
        pl.BlockSpec((Th, block_b, 2 * E), lambda i: (0, i, 0)),   # xp
        pl.BlockSpec((2 * E, 2 * C), lambda i: (0, 0)),            # w1p (block-diag, BN folded)
        pl.BlockSpec((1, 2 * C), lambda i: (0, 0)),                # shift1 (paired)
        pl.BlockSpec((2 * C, C), lambda i: (0, 0)),                # w2p (taps stacked, BN folded)
        pl.BlockSpec((1, C), lambda i: (0, 0)),                    # shift2
        pl.BlockSpec((Th, C, S), lambda i: (0, 0, 0)),             # wfc_r (Flatten folded)
        pl.BlockSpec((1, S), lambda i: (0, 0)),                    # bfc
    ]

    return pl.pallas_call(
        _fused_kernel,
        out_shape=jax.ShapeDtypeStruct((B, S), jnp.float32),
        grid_spec=pltpu.PrefetchScalarGridSpec(
            num_scalar_prefetch=0,
            grid=grid,
            in_specs=in_specs,
            out_specs=pl.BlockSpec((block_b, S), lambda i: (i, 0)),
        ),
        compiler_params=pltpu.CompilerParams(dimension_semantics=("parallel",)),
    )(xp, kparams['w1p'], kparams['s1p'], kparams['w2p'], kparams['s2'],
      kparams['wfc_r'], kparams['bfc'])


# ----------------------------------------------------------------------------- params

def init_reference_params(key, E, T, C, S):
    """Deterministic synthetic parameters in 'torch form' (shapes mirror the PyTorch module)."""
    Th = T // 2
    eps = 1e-5
    ks = jax.random.split(key, 16)

    def bn_fold(kg, kb, km, kv):
        gamma = 1.0 + 0.1 * jax.random.normal(kg, (1, C), jnp.float32)
        beta = 0.1 * jax.random.normal(kb, (1, C), jnp.float32)
        mean = 0.1 * jax.random.normal(km, (1, C), jnp.float32)
        var = jax.random.uniform(kv, (1, C), jnp.float32, minval=0.5, maxval=1.5)
        scale = gamma / jnp.sqrt(var + eps)
        shift = beta - mean * scale
        return scale, shift

    s1, h1 = bn_fold(ks[0], ks[1], ks[2], ks[3])
    s2, h2 = bn_fold(ks[4], ks[5], ks[6], ks[7])

    return dict(
        # Conv2d(1, 20, (E, 1)): weight (20,1,E,1) stored as (E, 20) matmul form.
        w1=0.1 * jax.random.normal(ks[8], (E, C), jnp.float32),
        b1=0.1 * jax.random.normal(ks[9], (1, C), jnp.float32),
        s1=s1, h1=h1,
        # Conv2d(20, 20, (1, 2), stride=(1, 2)): weight (20,20,1,2) as two (Cin, Cout) taps.
        w2k0=0.1 * jax.random.normal(ks[10], (C, C), jnp.float32),
        w2k1=0.1 * jax.random.normal(ks[11], (C, C), jnp.float32),
        b2=0.1 * jax.random.normal(ks[12], (1, C), jnp.float32),
        s2=s2, h2=h2,
        # Linear(20 * T//2, S): weight (S, 20*Th) stored transposed as (C*Th, S),
        # rows in torch Flatten order (index = c*Th + t).
        wfc=0.1 * jax.random.normal(ks[13], (C * Th, S), jnp.float32),
        bfc=0.1 * jax.random.normal(ks[14], (1, S), jnp.float32),
    )


def prepare_params(ref, T):
    """Host-side prep: fold BN into conv weights, build paired/block-diag weights,
    fold the channel-major Flatten permutation into the fc weight."""
    C = C_OUT
    Th = T // 2
    E = ref['w1'].shape[0]
    S = ref['bfc'].shape[-1]

    # conv1 + BN1 fold
    w1f = ref['w1'] * ref['s1']                          # (E, C)
    shift1 = ref['b1'] * ref['s1'] + ref['h1']           # (1, C)
    # Block-diagonal weight for the (even|odd) packed input: (2E, 2C).
    w1p = jnp.zeros((2 * E, 2 * C), jnp.float32)
    w1p = w1p.at[:E, :C].set(w1f).at[E:, C:].set(w1f)
    s1p = jnp.concatenate([shift1, shift1], axis=1)      # (1, 2C)

    # conv2 + BN2 fold: taps stacked along rows -> single (2C, C) matmul.
    w2p = jnp.concatenate([ref['w2k0'] * ref['s2'],
                           ref['w2k1'] * ref['s2']], axis=0)  # (2C, C)
    s2 = ref['b2'] * ref['s2'] + ref['h2']               # (1, C)

    # fc: torch flatten index = c*Th + t  ->  reorder rows to (t, c) and keep 3-D.
    wfc_r = ref['wfc'].reshape(C, Th, S).transpose(1, 0, 2)   # (Th, C, S)

    return dict(w1p=w1p, s1p=s1p, w2p=w2p, s2=s2, wfc_r=wfc_r, bfc=ref['bfc'])


# ----------------------------------------------------------------------------- reference

def torch_reference(x, params):
    """Pure-JAX re-statement of the PyTorch forward (NCHW convs) for validation."""
    B, T, E = x.shape
    xt = jnp.transpose(x, (0, 2, 1))[:, None, :, :]                    # (B,1,E,T) NCHW
    w1_oihw = jnp.transpose(params['w1'], (1, 0))[:, None, :, None]    # (C,1,E,1)
    y = jax.lax.conv_general_dilated(xt, w1_oihw, (1, 1), 'VALID',
                                     dimension_numbers=('NCHW', 'OIHW', 'NCHW'))
    y = y + params['b1'][0][None, :, None, None]
    y = y * params['s1'][0][None, :, None, None] + params['h1'][0][None, :, None, None]
    y = jnp.maximum(y, 0.0)                                            # (B,C,1,T)
    w2_oihw = jnp.stack([params['w2k0'].T, params['w2k1'].T], axis=-1)[:, :, None, :]  # (C,C,1,2)
    y = jax.lax.conv_general_dilated(y, w2_oihw, (1, 2), 'VALID',
                                     dimension_numbers=('NCHW', 'OIHW', 'NCHW'))
    y = y + params['b2'][0][None, :, None, None]
    y = y * params['s2'][0][None, :, None, None] + params['h2'][0][None, :, None, None]
    y = jnp.maximum(y, 0.0)                                            # (B,C,1,T//2)
    flat = y.reshape(B, -1)                                            # torch Flatten (channel-major)
    return flat @ params['wfc'] + params['bfc']


# ----------------------------------------------------------------------------- main

if __name__ == "__main__":
    # Small shapes consistent with the module: electrode_embed_num=8, timepoint_num=16, seen_num=6.
    B, T, E, S = 2, 16, 8, 6
    key = jax.random.PRNGKey(0)
    kx, kp = jax.random.split(key)
    x = jax.random.normal(kx, (B, T, E), jnp.float32)

    ref_params = init_reference_params(kp, E, T, C_OUT, S)
    kparams = prepare_params(ref_params, T)

    out = jax.jit(classification_net_forward)(x, kparams)
    out = jax.block_until_ready(out)

    ref = jax.block_until_ready(torch_reference(x, ref_params))
    assert out.shape == (B, S), out.shape
    assert jnp.allclose(out, ref, rtol=1e-4, atol=1e-4), (out, ref)
    print("KERNEL_OK")
</pallas_src>

<mosaic_0001>
module attributes {stable_mosaic.version = 11 : i64} {
  func.func @_fused_kernel(%arg0: i32, %arg1: memref<8x2x16xf32, #tpu.memory_space<vmem>>, %arg2: memref<16x40xf32, #tpu.memory_space<vmem>>, %arg3: memref<1x40xf32, #tpu.memory_space<vmem>>, %arg4: memref<40x20xf32, #tpu.memory_space<vmem>>, %arg5: memref<1x20xf32, #tpu.memory_space<vmem>>, %arg6: memref<8x20x6xf32, #tpu.memory_space<vmem>>, %arg7: memref<1x6xf32, #tpu.memory_space<vmem>>, %arg8: memref<2x6xf32, #tpu.memory_space<vmem>>) attributes {dimension_semantics = [#tpu.dimension_semantics<parallel>], iteration_bounds = array<i64: 1>, scalar_prefetch = 0 : i64, scratch_operands = 0 : i64, tpu.core_type = #tpu.core_type<tc>, window_params = [{transform_indices = @transform_0, window_bounds = array<i64: 8, 2, 16>}, {pipeline_mode = #tpu.pipeline_mode<synchronous>, transform_indices = @transform_1, window_bounds = array<i64: 16, 40>}, {pipeline_mode = #tpu.pipeline_mode<synchronous>, transform_indices = @transform_2, window_bounds = array<i64: 1, 40>}, {pipeline_mode = #tpu.pipeline_mode<synchronous>, transform_indices = @transform_3, window_bounds = array<i64: 40, 20>}, {pipeline_mode = #tpu.pipeline_mode<synchronous>, transform_indices = @transform_4, window_bounds = array<i64: 1, 20>}, {pipeline_mode = #tpu.pipeline_mode<synchronous>, transform_indices = @transform_5, window_bounds = array<i64: 8, 20, 6>}, {pipeline_mode = #tpu.pipeline_mode<synchronous>, transform_indices = @transform_6, window_bounds = array<i64: 1, 6>}, {transform_indices = @transform_7, window_bounds = array<i64: 2, 6>}]} {
    %c0 = arith.constant 0 : index
    %c0_0 = arith.constant 0 : index
    %c0_1 = arith.constant 0 : index
    %0 = vector.load %arg1[%c0, %c0_0, %c0_1] : memref<8x2x16xf32, #tpu.memory_space<vmem>>, vector<8x2x16xf32>
    %c0_2 = arith.constant 0 : index
    %c0_3 = arith.constant 0 : index
    %1 = vector.load %arg2[%c0_2, %c0_3] : memref<16x40xf32, #tpu.memory_space<vmem>>, vector<16x40xf32>
    "tpu.trace_start"() <{level = 10 : i32, message = "tbe,ef->tbf"}> : () -> ()
    %cst = arith.constant dense<0.000000e+00> : vector<8x2x40xf32>
    %2 = tpu.matmul %0, %1, %cst {dimension_numbers = #tpu.dot_dimension_numbers<[2], [0], [0, 1], [1], [0, 0, 0, 1, 1, 1], [], []>} : vector<8x2x16xf32>, vector<16x40xf32>, vector<8x2x40xf32> -> vector<8x2x40xf32>
    "tpu.trace_stop"() : () -> ()
    %c0_4 = arith.constant 0 : index
    %c0_5 = arith.constant 0 : index
    %3 = vector.load %arg3[%c0_4, %c0_5] : memref<1x40xf32, #tpu.memory_space<vmem>>, vector<1x40xf32>
    %4 = vector.shape_cast %3 : vector<1x40xf32> to vector<1x1x40xf32>
    %5 = vector.broadcast %4 : vector<1x1x40xf32> to vector<8x2x40xf32>
    %6 = arith.addf %2, %5 : vector<8x2x40xf32>
    %cst_6 = arith.constant 0.000000e+00 : f32
    %7 = vector.broadcast %cst_6 : f32 to vector<8x2x40xf32>
    %8 = arith.maximumf %6, %7 : vector<8x2x40xf32>
    %c0_7 = arith.constant 0 : index
    %c0_8 = arith.constant 0 : index
    %9 = vector.load %arg4[%c0_7, %c0_8] : memref<40x20xf32, #tpu.memory_space<vmem>>, vector<40x20xf32>
    "tpu.trace_start"() <{level = 10 : i32, message = "tbf,fc->tbc"}> : () -> ()
    %cst_9 = arith.constant dense<0.000000e+00> : vector<8x2x20xf32>
    %10 = tpu.matmul %8, %9, %cst_9 {dimension_numbers = #tpu.dot_dimension_numbers<[2], [0], [0, 1], [1], [0, 0, 0, 1, 1, 1], [], []>} : vector<8x2x40xf32>, vector<40x20xf32>, vector<8x2x20xf32> -> vector<8x2x20xf32>
    "tpu.trace_stop"() : () -> ()
    %c0_10 = arith.constant 0 : index
    %c0_11 = arith.constant 0 : index
    %11 = vector.load %arg5[%c0_10, %c0_11] : memref<1x20xf32, #tpu.memory_space<vmem>>, vector<1x20xf32>
    %12 = vector.shape_cast %11 : vector<1x20xf32> to vector<1x1x20xf32>
    %13 = vector.broadcast %12 : vector<1x1x20xf32> to vector<8x2x20xf32>
    %14 = arith.addf %10, %13 : vector<8x2x20xf32>
    %cst_12 = arith.constant 0.000000e+00 : f32
    %15 = vector.broadcast %cst_12 : f32 to vector<8x2x20xf32>
    %16 = arith.maximumf %14, %15 : vector<8x2x20xf32>
    %c0_13 = arith.constant 0 : index
    %c0_14 = arith.constant 0 : index
    %c0_15 = arith.constant 0 : index
    %17 = vector.load %arg6[%c0_13, %c0_14, %c0_15] : memref<8x20x6xf32, #tpu.memory_space<vmem>>, vector<8x20x6xf32>
    "tpu.trace_start"() <{level = 10 : i32, message = "tbc,tcs->tbs"}> : () -> ()
    %cst_16 = arith.constant dense<0.000000e+00> : vector<8x2x6xf32>
    %18 = tpu.matmul %16, %17, %cst_16 {dimension_numbers = #tpu.dot_dimension_numbers<[2], [1], [1], [2], [0, 0, 0, 1, 1, 2], [0], [0]>} : vector<8x2x20xf32>, vector<8x20x6xf32>, vector<8x2x6xf32> -> vector<8x2x6xf32>
    "tpu.trace_stop"() : () -> ()
    %cst_17 = arith.constant dense<0.000000e+00> : vector<2x6xf32>
    %19 = vector.multi_reduction <add>, %18, %cst_17 [0] : vector<8x2x6xf32> to vector<2x6xf32>
    %c0_18 = arith.constant 0 : index
    %c0_19 = arith.constant 0 : index
    %20 = vector.load %arg7[%c0_18, %c0_19] : memref<1x6xf32, #tpu.memory_space<vmem>>, vector<1x6xf32>
    %21 = vector.broadcast %20 : vector<1x6xf32> to vector<2x6xf32>
    %22 = arith.addf %19, %21 : vector<2x6xf32>
    %c0_20 = arith.constant 0 : index
    %c0_21 = arith.constant 0 : index
    %23 = vector.load %arg8[%c0_20, %c0_21] : memref<2x6xf32, #tpu.memory_space<vmem>>, vector<2x6xf32>
    tpu.vector_store %arg8[%c0_20, %c0_21], %22 {strides = array<i32>} : memref<2x6xf32, #tpu.memory_space<vmem>>, vector<2x6xf32>,
    return
  }
  func.func @transform_0(%arg0: i32) -> (i32, i32, i32) {
    %c0_i32 = arith.constant 0 : i32
    %c0_i32_0 = arith.constant 0 : i32
    %c0_i32_1 = arith.constant 0 : i32
    return %c0_i32, %arg0, %c0_i32_0 : i32, i32, i32
  }
  func.func @transform_1(%arg0: i32) -> (i32, i32) {
    %c0_i32 = arith.constant 0 : i32
    %c0_i32_0 = arith.constant 0 : i32
    %c0_i32_1 = arith.constant 0 : i32
    return %c0_i32, %c0_i32_0 : i32, i32
  }
  func.func @transform_2(%arg0: i32) -> (i32, i32) {
    %c0_i32 = arith.constant 0 : i32
    %c0_i32_0 = arith.constant 0 : i32
    %c0_i32_1 = arith.constant 0 : i32
    return %c0_i32, %c0_i32_0 : i32, i32
  }
  func.func @transform_3(%arg0: i32) -> (i32, i32) {
    %c0_i32 = arith.constant 0 : i32
    %c0_i32_0 = arith.constant 0 : i32
    %c0_i32_1 = arith.constant 0 : i32
    return %c0_i32, %c0_i32_0 : i32, i32
  }
  func.func @transform_4(%arg0: i32) -> (i32, i32) {
    %c0_i32 = arith.constant 0 : i32
    %c0_i32_0 = arith.constant 0 : i32
    %c0_i32_1 = arith.constant 0 : i32
    return %c0_i32, %c0_i32_0 : i32, i32
  }
  func.func @transform_5(%arg0: i32) -> (i32, i32, i32) {
    %c0_i32 = arith.constant 0 : i32
    %c0_i32_0 = arith.constant 0 : i32
    %c0_i32_1 = arith.constant 0 : i32
    %c0_i32_2 = arith.constant 0 : i32
    return %c0_i32, %c0_i32_0, %c0_i32_1 : i32, i32, i32
  }
  func.func @transform_6(%arg0: i32) -> (i32, i32) {
    %c0_i32 = arith.constant 0 : i32
    %c0_i32_0 = arith.constant 0 : i32
    %c0_i32_1 = arith.constant 0 : i32
    return %c0_i32, %c0_i32_0 : i32, i32
  }
  func.func @transform_7(%arg0: i32) -> (i32, i32) {
    %c0_i32 = arith.constant 0 : i32
    %c0_i32_0 = arith.constant 0 : i32
    return %arg0, %c0_i32 : i32, i32
  }
}

</mosaic_0001>

<bundles_post_ra>
// kernel: classification_net_forward.1
= control target key start
LH: loop header
LB: loop body
LE: loop exit
PB: predicated region body
PF: predicated region fallthrough
CT: control target
= control target key end

     0   :  { %v56_v3 = vlaneseq  ;;  %v1318_v8 = vmov 1983009808   ;;  %s1578_s0 = inlined_call_operand.vmem [shape: f32[8,2,16], index: 0, kind: input, shape index: {}]   ;;  %s1579_s1 = inlined_call_operand.vmem [shape: f32[16,40], index: 1, kind: input, shape index: {}]   ;;  %s1580_s2 = inlined_call_operand.vmem [shape: f32[1,40], index: 2, kind: input, shape index: {}]   ;;  %s1581_s3 = inlined_call_operand.vmem [shape: f32[40,20], index: 3, kind: input, shape index: {}]   ;;  %s1582_s4 = inlined_call_operand.vmem [shape: f32[1,20], index: 4, kind: input, shape index: {}]   ;;  %s1583_s5 = inlined_call_operand.vmem [shape: f32[8,20,6], index: 5, kind: input, shape index: {}]   ;;  %s1584_s6 = inlined_call_operand.vmem [shape: f32[1,6], index: 6, kind: input, shape index: {}]   ;;  %s1585_s7 = inlined_call_operand.hbm [shape: f32[2,6], index: 7, kind: output, shape index: {}]  }
   0x1   :  { %v35_v0 = vld [vmem:[%s1579_s1] sm:$0xff]  ;;  %v36_v1 = vld [vmem:[%s1579_s1 + $0x8] sm:$0xff]  ;;  %v54_v9 = vunpack.c.l.s4 %v1318_v8 }
   0x2   :  { %v27_v2 = vld [vmem:[%s1578_s0] sm:$0x3]  ;;  %v1253_v4 = vpack.c.bf16 %v36_v1, %v35_v0  ;;  %v28_v5 = vld [vmem:[%s1578_s0 + $0x2] sm:$0x3]  ;;  %v29_v6 = vld [vmem:[%s1578_s0 + $0x4] sm:$0x3] }
   0x3   :  { %v30_v7 = vld [vmem:[%s1578_s0 + $0x6] sm:$0x3]  ;;  %v57_v10 = vshrl.u32 %v56_v3, 7  ;;  %v31_v11 = vld [vmem:[%s1578_s0 + $0x8] sm:$0x3]  ;;  %v51_v13 = vcombine.low %v27_v2, %v28_v5  ;;  %v55_v15 = vunpack.c.0.s8 %v54_v9 }
   0x4   :  { %v32_v12 = vld [vmem:[%s1578_s0 + $0xa] sm:$0x3]  ;;  %1254 = vmatprep.subr.bf16.mxu1 %v1253_v4  ;;  %v52_v14 = vcombine.low %v29_v6, %v30_v7  ;;  %v33_v16 = vld [vmem:[%s1578_s0 + $0xc] sm:$0x3]  ;;  %v34_v17 = vld [vmem:[%s1578_s0 + $0xe] sm:$0x3] }
   0x5   :  { %v68_v18 = vcombine.low %v31_v11, %v32_v12  ;;  %1256 = vmatpush3.bf16.msra.mxu1 %v1253_v4  ;;  %v69_v19 = vcombine.low %v33_v16, %v34_v17 }
   0x6   :  { %12 = vsyncpa [#allocation3], 0  ;;  %v1393_v20 = vsub.s32 %v55_v15, %v57_v10  ;;  %vm95_vm0 = vcmask 130048   ;;  %v227_v27 = vld [vmem:[%s1581_s3] sm:$0xff]  ;;  %v228_v28 = vld [vmem:[%s1581_s3 + $0x8] sm:$0xff]  ;;  %vm290_vm1 = vcmask 326656  }
   0x7   :  { %v1257_v29 = vpack.c.bf16 %v228_v28, %v227_v27  ;;  %v229_v30 = vld [vmem:[%s1581_s3 + $0x10] sm:$0xff]  ;;  %v230_v31 = vld [vmem:[%s1581_s3 + $0x18] sm:$0xff]  ;;  %v231_v33 = vld [vmem:[%s1581_s3 + $0x20] sm:$0xff]  ;;  %v1319_v9 = vmov 0.0|0.0   ;;  %vm450_vm2 = vcmask 1043456   ;;  %vm1321_vm3 = vmmov 0  }
   0x8   :  { %v59_v21 = vrot.slane %v51_v13, %v1393_v20  ;;  %v66_v22 = vrot.slane %v52_v14, %v1393_v20  ;;  %v76_v23 = vrot.slane %v68_v18, %v1393_v20  ;;  %v83_v24 = vrot.slane %v69_v19, %v1393_v20  ;;  %v1095_v34 = vld [vmem:[%s1580_s2] ss:$0 sm:$0xff]  ;;  %v423_v7 = vld [vmem:[%s1583_s5 + $0x8] sm:$0xff]  ;;  %1265 = vmatprep.subr.bf16.mxu0 %v1319_v9  ;;  %v428_v10 = vld [vmem:[%s1583_s5 + $0x30] sm:$0xff]  ;;  %s1322_s26 = smov [#allocation2]  }
   0x9   :  { %1258 = vmatprep.subr.bf16.mxu1 %v1257_v29  ;;  %v1261_v32 = vpack.c.bf16 %v230_v31, %v229_v30  ;;  %v85_v35 = vcombine.low %v1095_v34, %v1095_v34  ;;  %v422_v6 = vld [vmem:[%s1583_s5] sm:$0xff]  ;;  %v429_v11 = vld [vmem:[%s1583_s5 + $0x38] sm:$0xff]  ;;  %v1320_v13 = vmov 0.0   ;;  %v424_v14 = vld [vmem:[%s1583_s5 + $0x10] sm:$0xf]  ;;  %vm446_vm4 = vcmask 162816  }
   0xa   :  { %v67_v25 = vcombine.low %v59_v21, %v66_v22  ;;  %v84_v26 = vcombine.low %v76_v23, %v83_v24  ;;  %v1266_v8 = vpack.c.bf16 %v423_v7, %v422_v6  ;;  %v1272_v12 = vpack.c.bf16 %v429_v11, %v428_v10  ;;  %1187 = vmatprep.mubr.msk.f32.mxu0 %vm1321_vm3, %v1320_v13  ;;  %v430_v15 = vld [vmem:[%s1583_s5 + $0x40] sm:$0xf]  ;;  %v425_v24 = vld [vmem:[%s1583_s5 + $0x18] sm:$0xff]  ;;  %s1087_s27 = sshll.u32 %s1322_s26, 4  ;;  %s1088_s27 = int_to_ptr.vmem [resolvable:$true] %s1087_s27 }
   0xb   :  { %v92_v36 = vrot.slane %v85_v35, %v1393_v20  ;;  %v1098_v16 = vld [vmem:[%s1582_s4] ss:$0 sm:$0xff]  ;;  %vm1056_vm5 = vcmask 41984   ;;  %s1294_s28 = scalar_lea.vmem %s1088_s27, 32  ;;  %p1299_p1 = scmp.lt.s32.totalorder %s1088_s27, %s1088_s27 }
   0xc   :  { %1165 = vmatprep.mubr.msk.f32.mxu1 %vm95_vm0, %v67_v25  ;;  %1267 = vmatpush3.bf16.msra.mxu0 %v1266_v8  ;;  %v280_v17 = vcombine.low %v1098_v16, %v1098_v16  ;;  %v426_v25 = vld [vmem:[%s1583_s5 + $0x20] sm:$0xff]  ;;  %p1295_p0 = scmp.ne.s32.totalorder %s1088_s27, %s1294_s28  ;;  %p1300_p2 = scmp.lt.s32.totalorder %s1294_s28, %s1294_s28 }
   0xd   :  { %1166 = vmatmul.mubr.msk.f32.vlgmr.msra.gmra.mrb[0].mxu1 %vm95_vm0, %v84_v26  ;;  %v93_v37 = vcombine.low %v92_v36, %v92_v36  ;;  %1185 = vmatprep.subr.mxu0 %v1320_v13  ;;  %v434_v28 = vld [vmem:[%s1583_s5 + $0x60] sm:$0xff]  ;;  %v1269_v30 = vpack.c.bf16 %v426_v25, %v425_v24 }
   0xe   :  { %1260 = vmatpush3.bf16.msra.mxu1 %v1257_v29  ;;  %v287_v18 = vrot.slane %v280_v17, %v1393_v20  ;;  %v435_v29 = vld [vmem:[%s1583_s5 + $0x68] sm:$0xff]  ;;  %p1301_p3 = por %p1300_p2, %p1299_p1 }
   0xf   :  { %1262 = vmatprep.subr.bf16.mxu1 %v1261_v32  ;;  %v1278_v34 = vpack.c.bf16 %v435_v29, %v434_v28 }
  0x10   :  { %1186 = vmatpush3.msk.msra.mxu0 %vm450_vm2, %v424_v14  ;;  %v288_v19 = vcombine.low %v287_v18, %v287_v18  ;;  %p1302_p4 = pnand %p1301_p3, %p1295_p0 }
  0x11   :  { %1268 = vmatprep.subr.bf16.mxu0 %v1319_v9 }
  0x12   :  { %1264 = vmatpush3.bf16.msra.mxu1 %v1261_v32 }
  0x13   :  { %1176 = vmatprep.subr.mxu1 %v231_v33 }
  0x16   :  { %1177 = vmatpush3.msra.mxu1 %v231_v33 }
  0x17   :  { %1271 = vmatprep.subr.bf16.mxu1 %v1319_v9 }
  0xe0   :  { %v1167_v38 = vpop.f32.mrb[0].mxu1 }
  0xe1   :  { %v172_v39 = vadd.f32 %v1167_v38, %v93_v37  ;;  %v166_v40 = vpop.f32.mrb[1].mxu1  ;;  %v432_v38 = vld [vmem:[%s1583_s5 + $0x50] sm:$0xff] }
  0xe2   :  { %v167_v41 = vadd.f32 %v166_v40, %v93_v37  ;;  %v431_v37 = vld [vmem:[%s1583_s5 + $0x48] sm:$0xff] }
  0xe3   :  { %v194_v42 = vcombine.high %v172_v39, %v172_v39  ;;  %v201_v43 = vrot.slane %v172_v39, %v1393_v20  ;;  %v427_v40 = vld [vmem:[%s1583_s5 + $0x28] sm:$0xf] }
  0xe4   :  { %v177_v44 = vcombine.high %v167_v41, %v167_v41  ;;  %v184_v45 = vrot.slane %v167_v41, %v1393_v20  ;;  %v440_v41 = vld [vmem:[%s1583_s5 + $0x90] sm:$0xff] }
  0xe5   :  { %v208_v46 = vrot.slane %v194_v42, %v1393_v20  ;;  %v209_v47 = vcombine.high %v201_v43, %v201_v43  ;;  %v223_v55 = vmax.f32 %v201_v43, 0.0  ;;  %v441_v42 = vld [vmem:[%s1583_s5 + $0x98] sm:$0xff]  ;;  %v1275_v43 = vpack.c.bf16 %v432_v38, %v431_v37 }
  0xe6   :  { %v191_v48 = vrot.slane %v177_v44, %v1393_v20  ;;  %v192_v49 = vcombine.high %v184_v45, %v184_v45  ;;  %v219_v53 = vmax.f32 %v184_v45, 0.0 }
  0xe7   :  { %v210_v50 = vcombine.high %v208_v46, %v208_v46  ;;  %v224_v51 = vmax.f32 %v209_v47, 0.0  ;;  %v225_v56 = vmax.f32 %v208_v46, 0.0  ;;  %v436_v46 = vld [vmem:[%s1583_s5 + $0x70] sm:$0xf]  ;;  %v1284_v47 = vpack.c.bf16 %v441_v42, %v440_v41 }
  0xe8   :  { %v193_v52 = vcombine.high %v191_v48, %v191_v48  ;;  %v220_v54 = vmax.f32 %v192_v49, 0.0  ;;  %v221_v58 = vmax.f32 %v191_v48, 0.0 }
  0xe9   :  { %v226_v57 = vmax.f32 %v210_v50, 0.0  ;;  %v263_v61 = vcombine.low %v223_v55, %v224_v51  ;;  %v437_v50 = vld [vmem:[%s1583_s5 + $0x78] sm:$0xff]  ;;  %v438_v51 = vld [vmem:[%s1583_s5 + $0x80] sm:$0xff] }
  0xea   :  { %v222_v59 = vmax.f32 %v193_v52, 0.0  ;;  %v246_v60 = vcombine.low %v219_v53, %v220_v54  ;;  %v433_v53 = vld [vmem:[%s1583_s5 + $0x58] sm:$0xf]  ;;  %v1281_v54 = vpack.c.bf16 %v438_v51, %v437_v50 }
  0xeb   :  { %v264_v62 = vcombine.low %v225_v56, %v226_v57  ;;  %v271_v3 = vrot.slane %v263_v61, %v1393_v20 }
  0xec   :  { %v247_v63 = vcombine.low %v221_v58, %v222_v59  ;;  %v254_v1 = vrot.slane %v246_v60, %v1393_v20  ;;  %v443_v58 = vld [vmem:[%s1583_s5 + $0xa8] sm:$0xff]  ;;  %v444_v59 = vld [vmem:[%s1583_s5 + $0xb0] sm:$0xff] }
  0xed   :  { %v278_v0 = vrot.slane %v264_v62, %v1393_v20  ;;  %v439_v60 = vld [vmem:[%s1583_s5 + $0x88] sm:$0xf]  ;;  %v1287_v61 = vpack.c.bf16 %v444_v59, %v443_v58 }
  0xee   :  { %v261_v2 = vrot.slane %v247_v63, %v1393_v20 }
  0xef   :  { %v279_v5 = vcombine.low %v271_v3, %v278_v0  ;;  %v445_v0 = vld [vmem:[%s1583_s5 + $0xb8] sm:$0xf] }
  0xf0   :  { %v262_v4 = vcombine.low %v254_v1, %v261_v2 }
  0xf2   :  { %1178 = vmatprep.mubr.msk.f32.mxu1 %vm290_vm1, %v262_v4 }
  0xf3   :  { %1179 = vmatmul.mubr.msk.f32.vlgmr.msra.gmra.mrb[2].mxu1 %vm290_vm1, %v279_v5 }
  0xf4   :  { %1273 = vmatpush3.bf16.msra.mxu1 %v1272_v12  ;;  %1205 = vmatprep.mubr.msk.f32.mxu1 %vm1321_vm3, %v1320_v13 }
  0xf5   :  { %1203 = vmatprep.subr.mxu1 %v1320_v13 }
  0xf8   :  { %1204 = vmatpush3.msk.msra.mxu1 %vm450_vm2, %v430_v15 }
  0xf9   :  { %1277 = vmatprep.subr.bf16.mxu1 %v1319_v9 }
 0x1c6   :  { %v1180_v21 = vpop.f32.mrb[2].mxu1 }
 0x1c7   :  { %v361_v22 = vpop.f32.mrb[3].mxu1  ;;  %v367_v31 = vadd.f32 %v1180_v21, %v288_v19 }
 0x1c8   :  { %v362_v23 = vadd.f32 %v361_v22, %v288_v19 }
 0x1c9   :  { %v396_v39 = vrot.slane %v367_v31, %v1393_v20  ;;  %v389_v44 = vcombine.high %v367_v31, %v367_v31 }
 0x1ca   :  { %v372_v26 = vcombine.high %v362_v23, %v362_v23  ;;  %v379_v27 = vrot.slane %v362_v23, %v1393_v20 }
 0x1cb   :  { %v418_v48 = vmax.f32 %v396_v39, 0.0  ;;  %v403_v52 = vrot.slane %v389_v44, %v1393_v20  ;;  %v404_v56 = vcombine.high %v396_v39, %v396_v39 }
 0x1cc   :  { %v386_v32 = vrot.slane %v372_v26, %v1393_v20  ;;  %v414_v33 = vmax.f32 %v379_v27, 0.0  ;;  %v387_v35 = vcombine.high %v379_v27, %v379_v27  ;;  %v442_v20 = vld [vmem:[%s1583_s5 + $0xa0] sm:$0xf] }
 0x1cd   :  { %v420_v57 = vmax.f32 %v403_v52, 0.0  ;;  %v419_v62 = vmax.f32 %v404_v56, 0.0  ;;  %v405_v63 = vcombine.high %v403_v52, %v403_v52 }
 0x1ce   :  { %v416_v36 = vmax.f32 %v386_v32, 0.0  ;;  %1188 = vmatmul.mubr.msk.f32.vlgmr.msra.gmra.mrb[0].mxu0 %vm446_vm4, %v414_v33  ;;  %v415_v45 = vmax.f32 %v387_v35, 0.0  ;;  %v388_v49 = vcombine.high %v386_v32, %v386_v32  ;;  %v1117_v32 = vld [vmem:[%s1584_s6] ss:$0 sm:$0xff] }
 0x1cf   :  { %1270 = vmatpush3.bf16.msra.mxu0 %v1269_v30  ;;  %1196 = vmatprep.mubr.msk.f32.mxu0 %vm1321_vm3, %v1320_v13  ;;  %v421_v1 = vmax.f32 %v405_v63, 0.0 }
 0x1d0   :  { %1206 = vmatmul.mubr.msk.f32.vlgmr.msra.gmra.mrb[4].mxu1 %vm446_vm4, %v416_v36  ;;  %1194 = vmatprep.subr.mxu0 %v1320_v13  ;;  %v417_v55 = vmax.f32 %v388_v49, 0.0 }
 0x1d1   :  { %1279 = vmatpush3.bf16.msra.mxu1 %v1278_v34  ;;  %1223 = vmatprep.mubr.msk.f32.mxu1 %vm1321_vm3, %v1320_v13 }
 0x1d2   :  { %1221 = vmatprep.subr.mxu1 %v1320_v13 }
 0x1d3   :  { %1195 = vmatpush3.msk.msra.mxu0 %vm450_vm2, %v427_v40 }
 0x1d4   :  { %1197 = vmatmul.mubr.msk.f32.vlgmr.msra.gmra.mrb[2].mxu0 %vm446_vm4, %v415_v45  ;;  %1274 = vmatprep.subr.bf16.mxu0 %v1319_v9 }
 0x1d5   :  { %1276 = vmatpush3.bf16.msra.mxu0 %v1275_v43  ;;  %1222 = vmatpush3.msk.msra.mxu1 %vm450_vm2, %v436_v46 }
 0x1d6   :  { %1224 = vmatmul.mubr.msk.f32.vlgmr.msra.gmra.mrb[6].mxu1 %vm446_vm4, %v418_v48  ;;  %1283 = vmatprep.subr.bf16.mxu1 %v1319_v9 }
 0x1d7   :  { %1285 = vmatpush3.bf16.msra.mxu1 %v1284_v47  ;;  %1212 = vmatprep.subr.mxu0 %v1320_v13 }
 0x1d8   :  { %1214 = vmatprep.mubr.msk.f32.mxu0 %vm1321_vm3, %v1320_v13  ;;  %1239 = vmatprep.subr.mxu1 %v1320_v13 }
 0x1d9   :  { %1213 = vmatpush3.msk.msra.mxu0 %vm450_vm2, %v433_v53  ;;  %1241 = vmatprep.mubr.msk.f32.mxu1 %vm1321_vm3, %v1320_v13 }
 0x1da   :  { %1215 = vmatmul.mubr.msk.f32.vlgmr.msra.gmra.mrb[4].mxu0 %vm446_vm4, %v417_v55  ;;  %1280 = vmatprep.subr.bf16.mxu0 %v1319_v9 }
 0x1db   :  { %1282 = vmatpush3.bf16.msra.mxu0 %v1281_v54  ;;  %1240 = vmatpush3.msk.msra.mxu1 %vm450_vm2, %v442_v20 }
 0x1dc   :  { %1242 = vmatmul.mubr.msk.f32.vlgmr.msra.gmra.mrb[8].mxu1 %vm446_vm4, %v420_v57  ;;  %1230 = vmatprep.subr.mxu0 %v1320_v13 }
 0x1dd   :  { %1232 = vmatprep.mubr.msk.f32.mxu0 %vm1321_vm3, %v1320_v13 }
 0x1df   :  { %1231 = vmatpush3.msk.msra.mxu0 %vm450_vm2, %v439_v60 }
 0x1e0   :  { %1233 = vmatmul.mubr.msk.f32.vlgmr.msra.gmra.mrb[6].mxu0 %vm446_vm4, %v419_v62  ;;  %1286 = vmatprep.subr.bf16.mxu0 %v1319_v9 }
 0x1e1   :  { %1288 = vmatpush3.bf16.msra.mxu0 %v1287_v61  ;;  %1250 = vmatprep.mubr.msk.f32.mxu0 %vm1321_vm3, %v1320_v13 }
 0x1e2   :  { %1248 = vmatprep.subr.mxu0 %v1320_v13 }
 0x1e5   :  { %1249 = vmatpush3.msk.msra.mxu0 %vm450_vm2, %v445_v0 }
 0x1e6   :  { %1251 = vmatmul.mubr.msk.f32.vlgmr.msra.gmra.mrb[8].mxu0 %vm446_vm4, %v421_v1 }
 0x2a1   :  { %v520_v2 = vpop.f32.mrb[0].mxu0 }
 0x2a2   :  { %v1189_v3 = vpop.f32.mrb[1].mxu0  ;;  %v1057_v7 = vsel %vm1056_vm5, %v520_v2, 0.0 }
 0x2a3   :  { %v672_v4 = vpop.f32.mrb[4].mxu1 }
 0x2a4   :  { %v1207_v5 = vpop.f32.mrb[5].mxu1  ;;  %v1060_v12 = vsel %vm1056_vm5, %v672_v4, 0.0 }
 0x2a7   :  { %v596_v6 = vpop.f32.mrb[2].mxu0 }
 0x2a8   :  { %v1058_v8 = vsel %vm1056_vm5, %v596_v6, 0.0  ;;  %v1198_v9 = vpop.f32.mrb[3].mxu0 }
 0x2a9   :  { %v1059_v10 = vadd.f32 %v1058_v8, %v1057_v7  ;;  %v824_v11 = vpop.f32.mrb[6].mxu1 }
 0x2aa   :  { %v1225_v13 = vpop.f32.mrb[7].mxu1  ;;  %v1064_v21 = vsel %vm1056_vm5, %v824_v11, 0.0 }
 0x2ab   :  { %v1061_v14 = vadd.f32 %v1060_v12, %v1059_v10 }
 0x2ad   :  { %v748_v15 = vpop.f32.mrb[4].mxu0 }
 0x2ae   :  { %v1062_v16 = vsel %vm1056_vm5, %v748_v15, 0.0  ;;  %v1216_v17 = vpop.f32.mrb[5].mxu0 }
 0x2af   :  { %v1063_v18 = vadd.f32 %v1062_v16, %v1061_v14  ;;  %v976_v19 = vpop.f32.mrb[8].mxu1 }
 0x2b0   :  { %v1243_v22 = vpop.f32.mrb[9].mxu1  ;;  %v1068_v28 = vsel %vm1056_vm5, %v976_v19, 0.0 }
 0x2b1   :  { %v1065_v23 = vadd.f32 %v1064_v21, %v1063_v18 }
 0x2b3   :  { %v900_v24 = vpop.f32.mrb[6].mxu0 }
 0x2b4   :  { %v1066_v25 = vsel %vm1056_vm5, %v900_v24, 0.0  ;;  %v1234_v26 = vpop.f32.mrb[7].mxu0 }
 0x2b5   :  { %v1067_v27 = vadd.f32 %v1066_v25, %v1065_v23 }
 0x2b7   :  { %v1069_v29 = vadd.f32 %v1068_v28, %v1067_v27 }
 0x2b9   :  { %v1052_v30 = vpop.f32.mrb[8].mxu0 }
 0x2ba   :  { %v1070_v31 = vsel %vm1056_vm5, %v1052_v30, 0.0  ;;  %v1252_v33 = vpop.f32.mrb[9].mxu0 }
 0x2bb   :  { %v1071_v34 = vadd.f32 %v1070_v31, %v1069_v29 }
 0x2bd   :  { %v1079_v35 = vadd.f32 %v1117_v32, %v1071_v34 }
 0x2bf   :  { %1080 = vst.msk [vmem:[#allocation2] sm:$0x3] %vm1056_vm5, %v1079_v35 }
 0x2c0   :  { %1305 = shalt.err (!%p1302_p4)
}
 0x2c1   :  { %s1306_s2 = scalar_lea.hbm %s1585_s7, 32 }
 0x2c2   :  { %p1307_p5 = scmp.ne.s32.totalorder %s1585_s7, %s1306_s2  ;;  %p1310_p6 = scmp.lt.u32.totalorder %s1306_s2, %s1585_s7 }
 0x2c4   :  { %p1312_p7 = pnand %p1310_p6, %p1307_p5 }
 0x2c6   :  { %1315 = shalt.err (!%p1312_p7)
}
 0x2c7   :  { %1090 = dma.vmem_to_hbm [thread:$0]  %s1088_s27, 32, %s1585_s7, [#allocation3]  }
 0x2c8   :  { %1316 = dma.done.wait [#allocation3], 32  }
 0x2c9   :  { %1317 = vsyncadd [#allocation3], 4294967264 }
 0x2ca   :  { %1094 = vsyncpa [#allocation3], 1 }

</bundles_post_ra>
